<compile_context>
chip_gen: v7x
topology: tpu7x:2x2x1
jax: 0.10.0
libtpu: 0.0.40
codegen_flags: <defaults>
</compile_context>

<pallas_src>
import jax
import jax.numpy as jnp
from jax.experimental import pallas as pl
from jax.experimental.pallas import tpu as pltpu

HIDDEN_SIZE = 128
DEFAULT_TILE_B = 512   # sized against v7x's smaller (64 MiB) VMEM with big margin
LANE = 128


def _round_up(x, m):
    return ((x + m - 1) // m) * m


def _actor_kernel(x_ref, w1_ref, w2_ref, w3_ref, w4_ref, misc_ref, o_ref):
    hidden = w1_ref.shape[1]
    out_pad = o_ref.shape[-1]        # lane-padded output width (multiple of 128)

    # Packed small constants: rows 0..3 = b1,b2,b3,b4 ; row 4 = action-range
    # scale. b4/scale are zero-padded to out_pad (padded lanes stay exactly 0).
    misc = misc_ref[...]
    b1 = misc[0:1, :hidden]
    b2 = misc[1:2, :hidden]
    b3 = misc[2:3, :hidden]
    b4 = misc[3:4, :out_pad]
    scale = misc[4:5, :out_pad]

    # bf16 operands into the MXU, f32 accumulation, f32 element-wise epilogues.
    x = x_ref[...].astype(jnp.bfloat16)

    h = jnp.dot(x, w1_ref[...], preferred_element_type=jnp.float32) + b1
    h = jnp.maximum(h, 0.0)

    h = jnp.dot(h.astype(jnp.bfloat16), w2_ref[...],
                preferred_element_type=jnp.float32) + b2
    h = jnp.maximum(h, 0.0)

    h = jnp.dot(h.astype(jnp.bfloat16), w3_ref[...],
                preferred_element_type=jnp.float32) + b3
    h = jnp.maximum(h, 0.0)

    z = jnp.dot(h.astype(jnp.bfloat16), w4_ref[...],
                preferred_element_type=jnp.float32) + b4
    # tanh -> EUP; padded lanes: tanh(0)*0 == 0.  Full-width unmasked store.
    o_ref[...] = (jnp.tanh(z) * scale).astype(o_ref.dtype)


def actor_forward(state, params, action_range, *, tile_b=DEFAULT_TILE_B):
    """Fused Actor MLP as a single batch-gridded Pallas TPU kernel.

    state:        (B, input_size) float32
    params:       dict w1..w4 (in, out) and b1..b4 (1, out), float32
    action_range: (low, high); both PyTorch branches multiply the tanh output
                  by the same 2-vector => requires output_size == len(range).
    """
    b, in_size = state.shape
    hidden = params["w1"].shape[1]
    out_size = params["w4"].shape[1]

    scale_vec = jnp.asarray(action_range, dtype=jnp.float32).reshape(-1)
    assert scale_vec.shape[0] == out_size, (
        "action_range length must equal output_size (PyTorch broadcast semantics)")

    # --- lane-dense output padding --------------------------------------------
    out_pad = _round_up(out_size, LANE)
    misc_w = max(hidden, out_pad)

    # --- pack biases + scale into one (5, misc_w) f32 array -------------------
    def _row(v):
        v = jnp.asarray(v, dtype=jnp.float32).reshape(1, -1)
        return jnp.pad(v, ((0, 0), (0, misc_w - v.shape[1])))

    misc = jnp.concatenate(
        [_row(params["b1"]), _row(params["b2"]), _row(params["b3"]),
         _row(params["b4"]), _row(scale_vec)], axis=0)

    # --- bf16 weights for the MXU (W4 zero-padded to out_pad columns) ---------
    w1 = params["w1"].astype(jnp.bfloat16)
    w2 = params["w2"].astype(jnp.bfloat16)
    w3 = params["w3"].astype(jnp.bfloat16)
    w4 = jnp.pad(params["w4"], ((0, 0), (0, out_pad - out_size))).astype(jnp.bfloat16)

    # --- batch tiling ----------------------------------------------------------
    tile_b = min(tile_b, _round_up(b, 8))
    padded_b = _round_up(b, tile_b)
    if padded_b != b:
        state = jnp.pad(state, ((0, padded_b - b), (0, 0)))
    num_tiles = padded_b // tile_b

    weight_elems = in_size * hidden + 2 * hidden * hidden + hidden * out_pad
    cost = pl.CostEstimate(
        flops=2 * padded_b * weight_elems,
        transcendentals=padded_b * out_pad,
        bytes_accessed=(padded_b * in_size * 4 + padded_b * out_pad * 4
                        + weight_elems * 2 + misc.size * 4),
    )

    const2d = lambda i: (0, 0)

    out = pl.pallas_call(
        _actor_kernel,
        out_shape=jax.ShapeDtypeStruct((padded_b, out_pad), jnp.float32),
        grid=(num_tiles,),
        in_specs=[
            pl.BlockSpec((tile_b, in_size), lambda i: (i, 0)),   # state: batch-blocked
            pl.BlockSpec((in_size, hidden), const2d),            # W1 (resident)
            pl.BlockSpec((hidden, hidden), const2d),             # W2 (resident)
            pl.BlockSpec((hidden, hidden), const2d),             # W3 (resident)
            pl.BlockSpec((hidden, out_pad), const2d),            # W4 (resident, lane-padded)
            pl.BlockSpec((5, misc_w), const2d),                  # packed biases+scale
        ],
        out_specs=pl.BlockSpec((tile_b, out_pad), lambda i: (i, 0)),
        compiler_params=pltpu.CompilerParams(
            dimension_semantics=("parallel",)),                  # v7x: 2 TCs share batch
        cost_estimate=cost,
    )(state, w1, w2, w3, w4, misc)

    return out[:b, :out_size]


def init_actor_params(key, input_size, hidden_size, output_size):
    """Deterministic init mimicking nn.Linear default (uniform +-1/sqrt(fan_in))."""
    def linear(k, fan_in, fan_out):
        kw, kb = jax.random.split(k)
        bound = 1.0 / jnp.sqrt(fan_in)
        w = jax.random.uniform(kw, (fan_in, fan_out), jnp.float32, -bound, bound)
        b = jax.random.uniform(kb, (1, fan_out), jnp.float32, -bound, bound)
        return w, b

    k1, k2, k3, k4 = jax.random.split(key, 4)
    w1, b1 = linear(k1, input_size, hidden_size)
    w2, b2 = linear(k2, hidden_size, hidden_size)
    w3, b3 = linear(k3, hidden_size, hidden_size)
    w4, b4 = linear(k4, hidden_size, output_size)
    return {"w1": w1, "b1": b1, "w2": w2, "b2": b2,
            "w3": w3, "b3": b3, "w4": w4, "b4": b4}


def actor_forward_ref(state, params, action_range):
    """Pure-JAX reference with matching bf16-operand / f32-accumulate arithmetic."""
    def mm(x, w):
        return jnp.dot(x.astype(jnp.bfloat16), w.astype(jnp.bfloat16),
                       preferred_element_type=jnp.float32)

    scale = jnp.asarray(action_range, dtype=jnp.float32)
    h = jax.nn.relu(mm(state, params["w1"]) + params["b1"])
    h = jax.nn.relu(mm(h, params["w2"]) + params["b2"])
    h = jax.nn.relu(mm(h, params["w3"]) + params["b3"])
    return (jnp.tanh(mm(h, params["w4"]) + params["b4"]) * scale).astype(jnp.float32)


if __name__ == "__main__":
    # Small shapes consistent with the module; action_range 2-vector => output_size == 2.
    batch = 8
    input_size = 32
    hidden_size = HIDDEN_SIZE
    output_size = 2
    action_range = (-2.0, 2.0)

    key = jax.random.PRNGKey(0)
    k_state, k_params, k_state2 = jax.random.split(key, 3)

    state = jax.random.normal(k_state, (batch, input_size), dtype=jnp.float32)
    params = init_actor_params(k_params, input_size, hidden_size, output_size)

    out = jax.block_until_ready(actor_forward(state, params, action_range))
    ref = actor_forward_ref(state, params, action_range)
    assert out.shape == (batch, output_size)
    assert out.dtype == jnp.float32
    assert jnp.allclose(out, ref, atol=5e-3, rtol=5e-3), "mismatch vs reference (B=8)"

    # Second check: batch not a multiple of 8 (exercises the padding path).
    batch2 = 37
    state2 = jax.random.normal(k_state2, (batch2, input_size), dtype=jnp.float32)
    out2 = jax.block_until_ready(actor_forward(state2, params, action_range))
    ref2 = actor_forward_ref(state2, params, action_range)
    assert out2.shape == (batch2, output_size)
    assert jnp.allclose(out2, ref2, atol=5e-3, rtol=5e-3), "mismatch vs reference (B=37)"

    print("KERNEL_OK")
</pallas_src>

<mosaic_0001>
module attributes {stable_mosaic.version = 11 : i64} {
  func.func @_actor_kernel(%arg0: i32, %arg1: memref<8x32xf32, #tpu.memory_space<vmem>>, %arg2: memref<32x128xbf16, #tpu.memory_space<vmem>>, %arg3: memref<128x128xbf16, #tpu.memory_space<vmem>>, %arg4: memref<128x128xbf16, #tpu.memory_space<vmem>>, %arg5: memref<128x128xbf16, #tpu.memory_space<vmem>>, %arg6: memref<5x128xf32, #tpu.memory_space<vmem>>, %arg7: memref<8x128xf32, #tpu.memory_space<vmem>>) attributes {dimension_semantics = [#tpu.dimension_semantics<parallel>], iteration_bounds = array<i64: 1>, scalar_prefetch = 0 : i64, scratch_operands = 0 : i64, tpu.core_type = #tpu.core_type<tc>, window_params = [{transform_indices = @transform_0, window_bounds = array<i64: 8, 32>}, {pipeline_mode = #tpu.pipeline_mode<synchronous>, transform_indices = @transform_1, window_bounds = array<i64: 32, 128>}, {pipeline_mode = #tpu.pipeline_mode<synchronous>, transform_indices = @transform_2, window_bounds = array<i64: 128, 128>}, {pipeline_mode = #tpu.pipeline_mode<synchronous>, transform_indices = @transform_3, window_bounds = array<i64: 128, 128>}, {pipeline_mode = #tpu.pipeline_mode<synchronous>, transform_indices = @transform_4, window_bounds = array<i64: 128, 128>}, {pipeline_mode = #tpu.pipeline_mode<synchronous>, transform_indices = @transform_5, window_bounds = array<i64: 5, 128>}, {transform_indices = @transform_6, window_bounds = array<i64: 8, 128>}]} {
    %c0 = arith.constant 0 : index
    %c0_0 = arith.constant 0 : index
    %0 = vector.load %arg6[%c0, %c0_0] : memref<5x128xf32, #tpu.memory_space<vmem>>, vector<5x128xf32>
    %1 = vector.extract_strided_slice %0 {offsets = [0, 0], sizes = [1, 128], strides = [1, 1]} : vector<5x128xf32> to vector<1x128xf32>
    %2 = vector.extract_strided_slice %0 {offsets = [1, 0], sizes = [1, 128], strides = [1, 1]} : vector<5x128xf32> to vector<1x128xf32>
    %3 = vector.extract_strided_slice %0 {offsets = [2, 0], sizes = [1, 128], strides = [1, 1]} : vector<5x128xf32> to vector<1x128xf32>
    %4 = vector.extract_strided_slice %0 {offsets = [3, 0], sizes = [1, 128], strides = [1, 1]} : vector<5x128xf32> to vector<1x128xf32>
    %5 = vector.extract_strided_slice %0 {offsets = [4, 0], sizes = [1, 128], strides = [1, 1]} : vector<5x128xf32> to vector<1x128xf32>
    %c0_1 = arith.constant 0 : index
    %c0_2 = arith.constant 0 : index
    %6 = vector.load %arg1[%c0_1, %c0_2] : memref<8x32xf32, #tpu.memory_space<vmem>>, vector<8x32xf32>
    %7 = arith.truncf %6 : vector<8x32xf32> to vector<8x32xbf16>
    %c0_3 = arith.constant 0 : index
    %c0_4 = arith.constant 0 : index
    %8 = vector.load %arg2[%c0_3, %c0_4] : memref<32x128xbf16, #tpu.memory_space<vmem>>, vector<32x128xbf16>
    %cst = arith.constant dense<0.000000e+00> : vector<8x128xf32>
    %9 = tpu.matmul %7, %8, %cst {dimension_numbers = #tpu.dot_dimension_numbers<[1], [0], [0], [1], [0, 0, 1, 1], [], []>} : vector<8x32xbf16>, vector<32x128xbf16>, vector<8x128xf32> -> vector<8x128xf32>
    %10 = vector.broadcast %1 : vector<1x128xf32> to vector<8x128xf32>
    %11 = arith.addf %9, %10 : vector<8x128xf32>
    %cst_5 = arith.constant 0.000000e+00 : f32
    %12 = vector.broadcast %cst_5 : f32 to vector<8x128xf32>
    %13 = arith.maximumf %11, %12 : vector<8x128xf32>
    %14 = arith.truncf %13 : vector<8x128xf32> to vector<8x128xbf16>
    %c0_6 = arith.constant 0 : index
    %c0_7 = arith.constant 0 : index
    %15 = vector.load %arg3[%c0_6, %c0_7] : memref<128x128xbf16, #tpu.memory_space<vmem>>, vector<128x128xbf16>
    %cst_8 = arith.constant dense<0.000000e+00> : vector<8x128xf32>
    %16 = tpu.matmul %14, %15, %cst_8 {dimension_numbers = #tpu.dot_dimension_numbers<[1], [0], [0], [1], [0, 0, 1, 1], [], []>} : vector<8x128xbf16>, vector<128x128xbf16>, vector<8x128xf32> -> vector<8x128xf32>
    %17 = vector.broadcast %2 : vector<1x128xf32> to vector<8x128xf32>
    %18 = arith.addf %16, %17 : vector<8x128xf32>
    %cst_9 = arith.constant 0.000000e+00 : f32
    %19 = vector.broadcast %cst_9 : f32 to vector<8x128xf32>
    %20 = arith.maximumf %18, %19 : vector<8x128xf32>
    %21 = arith.truncf %20 : vector<8x128xf32> to vector<8x128xbf16>
    %c0_10 = arith.constant 0 : index
    %c0_11 = arith.constant 0 : index
    %22 = vector.load %arg4[%c0_10, %c0_11] : memref<128x128xbf16, #tpu.memory_space<vmem>>, vector<128x128xbf16>
    %cst_12 = arith.constant dense<0.000000e+00> : vector<8x128xf32>
    %23 = tpu.matmul %21, %22, %cst_12 {dimension_numbers = #tpu.dot_dimension_numbers<[1], [0], [0], [1], [0, 0, 1, 1], [], []>} : vector<8x128xbf16>, vector<128x128xbf16>, vector<8x128xf32> -> vector<8x128xf32>
    %24 = vector.broadcast %3 : vector<1x128xf32> to vector<8x128xf32>
    %25 = arith.addf %23, %24 : vector<8x128xf32>
    %cst_13 = arith.constant 0.000000e+00 : f32
    %26 = vector.broadcast %cst_13 : f32 to vector<8x128xf32>
    %27 = arith.maximumf %25, %26 : vector<8x128xf32>
    %28 = arith.truncf %27 : vector<8x128xf32> to vector<8x128xbf16>
    %c0_14 = arith.constant 0 : index
    %c0_15 = arith.constant 0 : index
    %29 = vector.load %arg5[%c0_14, %c0_15] : memref<128x128xbf16, #tpu.memory_space<vmem>>, vector<128x128xbf16>
    %cst_16 = arith.constant dense<0.000000e+00> : vector<8x128xf32>
    %30 = tpu.matmul %28, %29, %cst_16 {dimension_numbers = #tpu.dot_dimension_numbers<[1], [0], [0], [1], [0, 0, 1, 1], [], []>} : vector<8x128xbf16>, vector<128x128xbf16>, vector<8x128xf32> -> vector<8x128xf32>
    %31 = vector.broadcast %4 : vector<1x128xf32> to vector<8x128xf32>
    %32 = arith.addf %30, %31 : vector<8x128xf32>
    %33 = math.tanh %32 : vector<8x128xf32>
    %34 = vector.broadcast %5 : vector<1x128xf32> to vector<8x128xf32>
    %35 = arith.mulf %33, %34 : vector<8x128xf32>
    %c0_17 = arith.constant 0 : index
    %c0_18 = arith.constant 0 : index
    %36 = vector.load %arg7[%c0_17, %c0_18] : memref<8x128xf32, #tpu.memory_space<vmem>>, vector<8x128xf32>
    tpu.vector_store %arg7[%c0_17, %c0_18], %35 {strides = array<i32>} : memref<8x128xf32, #tpu.memory_space<vmem>>, vector<8x128xf32>,
    return
  }
  func.func @transform_0(%arg0: i32) -> (i32, i32) {
    %c0_i32 = arith.constant 0 : i32
    %c0_i32_0 = arith.constant 0 : i32
    return %arg0, %c0_i32 : i32, i32
  }
  func.func @transform_1(%arg0: i32) -> (i32, i32) {
    %c0_i32 = arith.constant 0 : i32
    %c0_i32_0 = arith.constant 0 : i32
    %c0_i32_1 = arith.constant 0 : i32
    return %c0_i32, %c0_i32_0 : i32, i32
  }
  func.func @transform_2(%arg0: i32) -> (i32, i32) {
    %c0_i32 = arith.constant 0 : i32
    %c0_i32_0 = arith.constant 0 : i32
    %c0_i32_1 = arith.constant 0 : i32
    return %c0_i32, %c0_i32_0 : i32, i32
  }
  func.func @transform_3(%arg0: i32) -> (i32, i32) {
    %c0_i32 = arith.constant 0 : i32
    %c0_i32_0 = arith.constant 0 : i32
    %c0_i32_1 = arith.constant 0 : i32
    return %c0_i32, %c0_i32_0 : i32, i32
  }
  func.func @transform_4(%arg0: i32) -> (i32, i32) {
    %c0_i32 = arith.constant 0 : i32
    %c0_i32_0 = arith.constant 0 : i32
    %c0_i32_1 = arith.constant 0 : i32
    return %c0_i32, %c0_i32_0 : i32, i32
  }
  func.func @transform_5(%arg0: i32) -> (i32, i32) {
    %c0_i32 = arith.constant 0 : i32
    %c0_i32_0 = arith.constant 0 : i32
    %c0_i32_1 = arith.constant 0 : i32
    return %c0_i32, %c0_i32_0 : i32, i32
  }
  func.func @transform_6(%arg0: i32) -> (i32, i32) {
    %c0_i32 = arith.constant 0 : i32
    %c0_i32_0 = arith.constant 0 : i32
    return %arg0, %c0_i32 : i32, i32
  }
}

</mosaic_0001>

<bundles_post_ra>
// kernel: tpu_custom_call.1
= control target key start
LH: loop header
LB: loop body
LE: loop exit
PB: predicated region body
PF: predicated region fallthrough
CT: control target
= control target key end

     0   :  { %11 = vsyncpa [#allocation3], 0  ;;  %s995_s0 = inlined_call_operand.hbm [shape: f32[8,32], index: 0, kind: input, shape index: {}]   ;;  %s996_s1 = inlined_call_operand.hbm [shape: bf16[32,128], index: 1, kind: input, shape index: {}]   ;;  %s997_s2 = inlined_call_operand.hbm [shape: bf16[128,128], index: 2, kind: input, shape index: {}]   ;;  %s998_s3 = inlined_call_operand.hbm [shape: bf16[128,128], index: 3, kind: input, shape index: {}]   ;;  %s999_s4 = inlined_call_operand.hbm [shape: bf16[128,128], index: 4, kind: input, shape index: {}]   ;;  %s1000_s5 = inlined_call_operand.vmem [shape: f32[5,128], index: 5, kind: input, shape index: {}]   ;;  %s1001_s6 = inlined_call_operand.hbm [shape: f32[8,128], index: 6, kind: output, shape index: {}]  }
   0x1   :  { %12 = vsyncpa [#allocation6], 0 }
   0x2   :  { %13 = vsyncpa [#allocation9], 0 }
   0x3   :  { %14 = vsyncpa [#allocation4], 0  ;;  %s815_s21 = smov [#allocation5]   ;;  %s675_s25 = scalar_lea.hbm %s996_s1, 256 }
   0x4   :  { %s30_s22 = sshll.u32 %s815_s21, 4  ;;  %p676_p0 = scmp.ne.s32.totalorder %s996_s1, %s675_s25  ;;  %s31_s22 = int_to_ptr.vmem [resolvable:$true] %s30_s22 }
   0x5   :  { %p679_p1 = scmp.lt.u32.totalorder %s675_s25, %s996_s1 }
   0x7   :  { %p681_p2 = pnand %p679_p1, %p676_p0 }
   0x9   :  { %684 = shalt.err (!%p681_p2)
}
   0xa   :  { %s685_s30 = scalar_lea.vmem %s31_s22, 256  ;;  %p690_p4 = scmp.lt.s32.totalorder %s31_s22, %s31_s22 }
   0xb   :  { %p686_p3 = scmp.ne.s32.totalorder %s31_s22, %s685_s30  ;;  %p691_p5 = scmp.lt.s32.totalorder %s685_s30, %s685_s30 }
   0xd   :  { %p692_p6 = por %p691_p5, %p690_p4 }
   0xf   :  { %p693_p7 = pnand %p692_p6, %p686_p3 }
  0x11   :  { %696 = shalt.err (!%p693_p7)
}
  0x12   :  { %s816_s7 = smov 64   ;;  %s817_s8 = smov 4  }
  0x13   :  { %36 = dma.hbm_to_vmem [thread:$0]  %s996_s1, 256, %s31_s22, [#allocation6], %s816_s7, %s816_s7, %s817_s8  }
  0x14   :  { %s818_s11 = smov [#allocation8]   ;;  %s819_s13 = smov [#allocation2]  }
  0x15   :  { %s54_s12 = sshll.u32 %s818_s11, 4  ;;  %s21_s14 = sshll.u32 %s819_s13, 4  ;;  %s55_s12 = int_to_ptr.vmem [resolvable:$true] %s54_s12  ;;  %s22_s14 = int_to_ptr.vmem [resolvable:$true] %s21_s14 }
  0x16   :  { %s697_s17 = scalar_lea.hbm %s998_s3, 1024 }
  0x17   :  { %p698_p8 = scmp.ne.s32.totalorder %s998_s3, %s697_s17  ;;  %p701_p9 = scmp.lt.u32.totalorder %s697_s17, %s998_s3 }
  0x19   :  { %p703_p10 = pnand %p701_p9, %p698_p8 }
  0x1b   :  { %706 = shalt.err (!%p703_p10)
}
  0x1c   :  { %s707_s1 = scalar_lea.vmem %s55_s12, 1024  ;;  %p712_p12 = scmp.lt.s32.totalorder %s55_s12, %s55_s12 }
  0x1d   :  { %p708_p11 = scmp.ne.s32.totalorder %s55_s12, %s707_s1  ;;  %p713_p13 = scmp.lt.s32.totalorder %s707_s1, %s707_s1 }
  0x1f   :  { %p714_p0 = por %p713_p13, %p712_p12 }
  0x21   :  { %p715_p1 = pnand %p714_p0, %p708_p11 }
  0x23   :  { %718 = shalt.err (!%p715_p1)
}
  0x24   :  { %60 = dma.hbm_to_vmem [thread:$0]  %s998_s3, 1024, %s55_s12, [#allocation9], %s816_s7, %s816_s7, %s817_s8  }
  0x25   :  { %s719_s26 = scalar_lea.hbm %s995_s0, 128 }
  0x26   :  { %p720_p2 = scmp.ne.s32.totalorder %s995_s0, %s719_s26  ;;  %p723_p3 = scmp.lt.u32.totalorder %s719_s26, %s995_s0 }
  0x28   :  { %p725_p4 = pnand %p723_p3, %p720_p2 }
  0x2a   :  { %728 = shalt.err (!%p725_p4)
}
  0x2b   :  { %s729_s9 = scalar_lea.vmem %s22_s14, 128  ;;  %p734_p6 = scmp.lt.s32.totalorder %s22_s14, %s22_s14 }
  0x2c   :  { %p730_p5 = scmp.ne.s32.totalorder %s22_s14, %s729_s9  ;;  %p735_p7 = scmp.lt.s32.totalorder %s729_s9, %s729_s9 }
  0x2e   :  { %p736_p8 = por %p735_p7, %p734_p6 }
  0x30   :  { %p737_p9 = pnand %p736_p8, %p730_p5 }
  0x32   :  { %740 = shalt.err (!%p737_p9)
}
  0x33   :  { %24 = dma.hbm_to_vmem [thread:$0]  %s995_s0, 128, %s22_s14, [#allocation3]  }
  0x34   :  { %s820_s11 = smov [#allocation7]   ;;  %s821_s13 = smov [#allocation10]  }
  0x35   :  { %s42_s12 = sshll.u32 %s820_s11, 4  ;;  %s66_s15 = sshll.u32 %s821_s13, 4  ;;  %s43_s12 = int_to_ptr.vmem [resolvable:$true] %s42_s12  ;;  %s67_s15 = int_to_ptr.vmem [resolvable:$true] %s66_s15 }
  0x36   :  { %s741_s18 = scalar_lea.hbm %s997_s2, 1024 }
  0x37   :  { %p742_p10 = scmp.ne.s32.totalorder %s997_s2, %s741_s18  ;;  %p745_p11 = scmp.lt.u32.totalorder %s741_s18, %s997_s2 }
  0x39   :  { %p747_p12 = pnand %p745_p11, %p742_p10 }
  0x3b   :  { %750 = shalt.err (!%p747_p12)
}
  0x3c   :  { %s751_s0 = scalar_lea.vmem %s43_s12, 1024  ;;  %p756_p0 = scmp.lt.s32.totalorder %s43_s12, %s43_s12 }
  0x3d   :  { %p752_p13 = scmp.ne.s32.totalorder %s43_s12, %s751_s0  ;;  %p757_p1 = scmp.lt.s32.totalorder %s751_s0, %s751_s0 }
  0x3f   :  { %p758_p2 = por %p757_p1, %p756_p0 }
  0x41   :  { %p759_p3 = pnand %p758_p2, %p752_p13 }
  0x43   :  { %762 = shalt.err (!%p759_p3)
}
  0x44   :  { %48 = dma.hbm_to_vmem [thread:$0]  %s997_s2, 1024, %s43_s12, [#allocation6], %s816_s7, %s816_s7, %s817_s8  }
  0x45   :  { %s763_s25 = scalar_lea.hbm %s999_s4, 1024 }
  0x46   :  { %p764_p4 = scmp.ne.s32.totalorder %s999_s4, %s763_s25  ;;  %p767_p5 = scmp.lt.u32.totalorder %s763_s25, %s999_s4 }
  0x48   :  { %p769_p6 = pnand %p767_p5, %p764_p4 }
  0x4a   :  { %772 = shalt.err (!%p769_p6)
}
  0x4b   :  { %s773_s30 = scalar_lea.vmem %s67_s15, 1024  ;;  %p778_p8 = scmp.lt.s32.totalorder %s67_s15, %s67_s15 }
  0x4c   :  { %p774_p7 = scmp.ne.s32.totalorder %s67_s15, %s773_s30  ;;  %p779_p9 = scmp.lt.s32.totalorder %s773_s30, %s773_s30 }
  0x4e   :  { %p780_p10 = por %p779_p9, %p778_p8 }
  0x50   :  { %p781_p11 = pnand %p780_p10, %p774_p7 }
  0x52   :  { %784 = shalt.err (!%p781_p11)
}
  0x53   :  { %72 = dma.hbm_to_vmem [thread:$0]  %s999_s4, 1024, %s67_s15, [#allocation9], %s816_s7, %s816_s7, %s817_s8  }
  0x54   :  { %807 = dma.done.wait [#allocation3], 128  }
  0x55   :  { %808 = vsyncadd [#allocation3], 4294967168 }
  0x56   :  { %809 = dma.done.wait [#allocation6], 1280  }
  0x57   :  { %810 = vsyncadd [#allocation6], 4294966016 }
  0x58   :  { %811 = dma.done.wait [#allocation9], 2048  }
  0x59   :  { %812 = vsyncadd [#allocation9], 4294965248  ;;  %v822_v0 = vmov 0.0   ;;  %vm823_vm0 = vmmov 0   ;;  %v647_v1 = vld [vmem:[#allocation5] sm:$0xff]   ;;  %v648_v2 = vld [vmem:[#allocation5 + $0x8] sm:$0xff]   ;;  %v98_v19 = vlaneseq }
  0x5a   :  { %569 = vmatprep.subr.bf16.mxu0 %v822_v0  ;;  %573 = vmatprep.mubr.msk.bf16.mxu0 %vm823_vm0, %v822_v0  ;;  %v92_v3 = vld [vmem:[#allocation2] sm:$0xff]  ;;  %v649_v4 = vld [vmem:[#allocation7] sm:$0xff]   ;;  %vm114_vm1 = vcmask 261120   ;;  %v651_v7 = vld [vmem:[#allocation7 + $0x10] sm:$0xff]  }
  0x5b   :  { %577 = vmatprep.subr.bf16.mxu1 %v822_v0  ;;  %593 = vmatprep.mubr.msk.bf16.mxu1 %vm823_vm0, %v822_v0  ;;  %v93_v5 = vpack.c.bf16 %v92_v3, %v92_v3  ;;  %v650_v6 = vld [vmem:[#allocation7 + $0x8] sm:$0xff]   ;;  %v652_v8 = vld [vmem:[#allocation7 + $0x18] sm:$0xff]   ;;  %v653_v9 = vld [vmem:[#allocation7 + $0x20] sm:$0xff]   ;;  %v956_v20 = vshrl.u32 %v98_v19, 7 }
  0x5c   :  { %570 = vmatpush3.bf16.msra.mxu0 %v647_v1  ;;  %578 = vmatpush3.bf16.msra.mxu1 %v649_v4  ;;  %v654_v10 = vld [vmem:[#allocation7 + $0x28] sm:$0xff]   ;;  %v655_v11 = vld [vmem:[#allocation7 + $0x30] sm:$0xff]   ;;  %v656_v12 = vld [vmem:[#allocation7 + $0x38] sm:$0xff]  }
  0x5d   :  { %571 = vmatprep.subr.bf16.mxu0 %v822_v0  ;;  %579 = vmatprep.subr.bf16.mxu1 %v822_v0  ;;  %v657_v13 = vld [vmem:[#allocation8] sm:$0xff]   ;;  %v658_v14 = vld [vmem:[#allocation8 + $0x8] sm:$0xff]   ;;  %v659_v15 = vld [vmem:[#allocation8 + $0x10] sm:$0xff]   ;;  %v100_v21 = vsub.s32 0, %v956_v20  ;;  %v178_v39 = vsub.s32 1, %v956_v20  ;;  %v288_v50 = vsub.s32 2, %v956_v20 }
  0x5e   :  { %v660_v16 = vld [vmem:[#allocation8 + $0x18] sm:$0xff]   ;;  %v661_v17 = vld [vmem:[#allocation8 + $0x20] sm:$0xff]   ;;  %v662_v18 = vld [vmem:[#allocation8 + $0x28] sm:$0xff]   ;;  %v398_v59 = vsub.s32 3, %v956_v20 }
  0x5f   :  { %v962_v22 = vld [vmem:[%s1000_s5] sm:$0x1f]  ;;  %v663_v31 = vld [vmem:[#allocation8 + $0x30] sm:$0xff]   ;;  %v664_v32 = vld [vmem:[#allocation8 + $0x38] sm:$0xff]   ;;  %s824_s5 = smov [#allocation11]  }
  0x60   :  { %572 = vmatpush3.bf16.msra.mxu0 %v648_v2  ;;  %580 = vmatpush3.bf16.msra.mxu1 %v650_v6  ;;  %v101_v23 = vrot.slane %v962_v22, %v100_v21  ;;  %v665_v33 = vld [vmem:[#allocation10] sm:$0xff]   ;;  %v666_v34 = vld [vmem:[#allocation10 + $0x8] sm:$0xff]   ;;  %v667_v35 = vld [vmem:[#allocation10 + $0x10] sm:$0xff]   ;;  %v179_v40 = vrot.slane %v962_v22, %v178_v39  ;;  %v289_v51 = vrot.slane %v962_v22, %v288_v50  ;;  %v491_v2 = vsub.s32 4, %v956_v20  ;;  %s501_s8 = sshll.u32 %s824_s5, 4  ;;  %s502_s8 = int_to_ptr.vmem [resolvable:$true] %s501_s8 }
  0x61   :  { %597 = vmatprep.subr.bf16.mxu0 %v822_v0  ;;  %581 = vmatprep.subr.bf16.mxu1 %v822_v0  ;;  %v668_v36 = vld [vmem:[#allocation10 + $0x18] sm:$0xff]   ;;  %v669_v37 = vld [vmem:[#allocation10 + $0x20] sm:$0xff]   ;;  %v670_v38 = vld [vmem:[#allocation10 + $0x28] sm:$0xff]   ;;  %v399_v60 = vrot.slane %v962_v22, %v398_v59  ;;  %s785_s3 = scalar_lea.vmem %s502_s8, 128  ;;  %p790_p13 = scmp.lt.s32.totalorder %s502_s8, %s502_s8 }
  0x62   :  { %v671_v48 = vld [vmem:[#allocation10 + $0x30] sm:$0xff]   ;;  %v672_v49 = vld [vmem:[#allocation10 + $0x38] sm:$0xff]   ;;  %v492_v3 = vrot.slane %v962_v22, %v491_v2  ;;  %p786_p12 = scmp.ne.s32.totalorder %s502_s8, %s785_s3  ;;  %p791_p0 = scmp.lt.s32.totalorder %s785_s3, %s785_s3 }
  0x63   :  { %574 = vmatmul.mubr.msk.bf16.vlgmr.msra.gmra.mrb[0].mxu0 %vm114_vm1, %v93_v5 }
  0x64   :  { %613 = vmatprep.mubr.msk.bf16.mxu0 %vm823_vm0, %v822_v0  ;;  %582 = vmatpush3.bf16.msra.mxu1 %v651_v7  ;;  %p792_p1 = por %p791_p0, %p790_p13 }
  0x65   :  { %583 = vmatprep.subr.bf16.mxu1 %v822_v0  ;;  %598 = vmatpush3.bf16.msra.mxu0 %v657_v13 }
  0x66   :  { %599 = vmatprep.subr.bf16.mxu0 %v822_v0  ;;  %p793_p2 = pnand %p792_p1, %p786_p12 }
  0x68   :  { %584 = vmatpush3.bf16.msra.mxu1 %v652_v8 }
  0x69   :  { %585 = vmatprep.subr.bf16.mxu1 %v822_v0  ;;  %600 = vmatpush3.bf16.msra.mxu0 %v658_v14 }
  0x6a   :  { %601 = vmatprep.subr.bf16.mxu0 %v822_v0 }
  0x6c   :  { %586 = vmatpush3.bf16.msra.mxu1 %v653_v9 }
  0x6d   :  { %587 = vmatprep.subr.bf16.mxu1 %v822_v0  ;;  %602 = vmatpush3.bf16.msra.mxu0 %v659_v15 }
  0x6e   :  { %603 = vmatprep.subr.bf16.mxu0 %v822_v0 }
  0x70   :  { %588 = vmatpush3.bf16.msra.mxu1 %v654_v10 }
  0x71   :  { %589 = vmatprep.subr.bf16.mxu1 %v822_v0  ;;  %604 = vmatpush3.bf16.msra.mxu0 %v660_v16 }
  0x72   :  { %605 = vmatprep.subr.bf16.mxu0 %v822_v0 }
  0x74   :  { %590 = vmatpush3.bf16.msra.mxu1 %v655_v11 }
  0x75   :  { %591 = vmatprep.subr.bf16.mxu1 %v822_v0  ;;  %606 = vmatpush3.bf16.msra.mxu0 %v661_v17 }
  0x76   :  { %607 = vmatprep.subr.bf16.mxu0 %v822_v0 }
  0x78   :  { %592 = vmatpush3.bf16.msra.mxu1 %v656_v12 }
  0x79   :  { %617 = vmatprep.subr.bf16.mxu1 %v822_v0  ;;  %608 = vmatpush3.bf16.msra.mxu0 %v662_v18 }
  0x7a   :  { %609 = vmatprep.subr.bf16.mxu0 %v822_v0 }
  0x7d   :  { %610 = vmatpush3.bf16.msra.mxu0 %v663_v31 }
  0x7e   :  { %611 = vmatprep.subr.bf16.mxu0 %v822_v0 }
  0x81   :  { %612 = vmatpush3.bf16.msra.mxu0 %v664_v32 }
 0x136   :  { %v152_v24 = vpop.f32.mrb[0].mxu0 }
 0x137   :  { %v153_v25 = vadd.f32 %v152_v24, %v101_v23  ;;  %v575_v26 = vpop.f32.mrb[1].mxu0 }
 0x138   :  { %v155_v27 = vpop.f32.mrb[2].mxu0 }
 0x139   :  { %v158_v28 = vmax.f32 %v153_v25, 0.0  ;;  %v576_v29 = vpop.f32.mrb[3].mxu0 }
 0x13b   :  { %v159_v30 = vpack.c.bf16 %v158_v28, %v158_v28 }
 0x13d   :  { %594 = vmatmul.mubr.bf16.vlgmr.msra.gmra.mrb[0].mxu1 %v159_v30 }
 0x13e   :  { %633 = vmatprep.mubr.msk.bf16.mxu1 %vm823_vm0, %v822_v0  ;;  %618 = vmatpush3.bf16.msra.mxu1 %v665_v33 }
 0x13f   :  { %619 = vmatprep.subr.bf16.mxu1 %v822_v0 }
 0x142   :  { %620 = vmatpush3.bf16.msra.mxu1 %v666_v34 }
 0x143   :  { %621 = vmatprep.subr.bf16.mxu1 %v822_v0 }
 0x146   :  { %622 = vmatpush3.bf16.msra.mxu1 %v667_v35 }
 0x147   :  { %623 = vmatprep.subr.bf16.mxu1 %v822_v0 }
 0x14a   :  { %624 = vmatpush3.bf16.msra.mxu1 %v668_v36 }
 0x14b   :  { %625 = vmatprep.subr.bf16.mxu1 %v822_v0 }
 0x14e   :  { %626 = vmatpush3.bf16.msra.mxu1 %v669_v37 }
 0x14f   :  { %627 = vmatprep.subr.bf16.mxu1 %v822_v0 }
 0x152   :  { %628 = vmatpush3.bf16.msra.mxu1 %v670_v38 }
 0x153   :  { %629 = vmatprep.subr.bf16.mxu1 %v822_v0 }
 0x156   :  { %630 = vmatpush3.bf16.msra.mxu1 %v671_v48 }
 0x157   :  { %631 = vmatprep.subr.bf16.mxu1 %v822_v0 }
 0x15a   :  { %632 = vmatpush3.bf16.msra.mxu1 %v672_v49 }
 0x210   :  { %v262_v41 = vpop.f32.mrb[0].mxu1 }
 0x211   :  { %v263_v42 = vadd.f32 %v262_v41, %v179_v40  ;;  %v595_v43 = vpop.f32.mrb[1].mxu1 }
 0x212   :  { %v265_v44 = vpop.f32.mrb[2].mxu1 }
 0x213   :  { %v268_v45 = vmax.f32 %v263_v42, 0.0  ;;  %v596_v46 = vpop.f32.mrb[3].mxu1 }
 0x215   :  { %v269_v47 = vpack.c.bf16 %v268_v45, %v268_v45 }
 0x217   :  { %614 = vmatmul.mubr.bf16.vlgmr.msra.gmra.mrb[4].mxu0 %v269_v47 }
 0x2ea   :  { %v372_v52 = vpop.f32.mrb[4].mxu0 }
 0x2eb   :  { %v373_v53 = vadd.f32 %v372_v52, %v289_v51  ;;  %v615_v54 = vpop.f32.mrb[5].mxu0 }
 0x2ec   :  { %v375_v55 = vpop.f32.mrb[6].mxu0 }
 0x2ed   :  { %v378_v56 = vmax.f32 %v373_v53, 0.0  ;;  %v616_v57 = vpop.f32.mrb[7].mxu0 }
 0x2ef   :  { %v379_v58 = vpack.c.bf16 %v378_v56, %v378_v56 }
 0x2f1   :  { %634 = vmatmul.mubr.bf16.vlgmr.msra.gmra.mrb[4].mxu1 %v379_v58 }
 0x3c4   :  { %v482_v61 = vpop.f32.mrb[4].mxu1 }
 0x3c5   :  { %v483_v62 = vadd.f32 %v482_v61, %v399_v60  ;;  %v635_v63 = vpop.f32.mrb[5].mxu1 }
 0x3c6   :  { %v485_v0 = vpop.f32.mrb[6].mxu1 }
 0x3c7   :  { %673 = vtanh.f32 %v483_v62  ;;  %v636_v1 = vpop.f32.mrb[7].mxu1 }
 0x3d1   :  { %v674_v4 = vpop.eup %673 }
 0x3d2   :  { %v493_v5 = vmul.f32 %v674_v4, %v492_v3 }
 0x3d4   :  { %494 = vst [vmem:[#allocation11] sm:$0xff] %v493_v5 }
 0x3d5   :  { %796 = shalt.err (!%p793_p2)
}
 0x3d6   :  { %s797_s12 = scalar_lea.hbm %s1001_s6, 128 }
 0x3d7   :  { %p798_p3 = scmp.ne.s32.totalorder %s1001_s6, %s797_s12  ;;  %p801_p4 = scmp.lt.u32.totalorder %s797_s12, %s1001_s6 }
 0x3d9   :  { %p803_p5 = pnand %p801_p4, %p798_p3 }
 0x3db   :  { %806 = shalt.err (!%p803_p5)
}
 0x3dc   :  { %504 = dma.vmem_to_hbm [thread:$0]  %s502_s8, 128, %s1001_s6, [#allocation4]  }
 0x3dd   :  { %813 = dma.done.wait [#allocation4], 128  }
 0x3de   :  { %814 = vsyncadd [#allocation4], 4294967168 }
 0x3df   :  { %508 = vsyncpa [#allocation3], 1 }
 0x3e0   :  { %509 = vsyncpa [#allocation6], 1 }
 0x3e1   :  { %510 = vsyncpa [#allocation9], 1 }
 0x3e2   :  { %511 = vsyncpa [#allocation4], 1 }

</bundles_post_ra>
